<compile_context>
chip_gen: v6e
topology: v6e:2x2x1
jax: 0.10.0
libtpu: 0.0.40
codegen_flags: <defaults>
</compile_context>

<pallas_src>
import jax
import jax.numpy as jnp
from jax.experimental import pallas as pl
from jax.experimental.pallas import tpu as pltpu


def mlp3_relu_kernel(x_ref, w0_ref, b0_ref, w1_ref, b1_ref, w2_ref, b2_ref, o_ref):
    """Fused 3-layer MLP: (Linear + ReLU) x 3 on one batch tile.

    x/w refs hold bf16 (MXU operands); biases and accumulation are f32.
    """
    cd = x_ref.dtype
    x = x_ref[...]
    h0 = jnp.dot(x, w0_ref[...], preferred_element_type=jnp.float32) + b0_ref[...]
    h0 = jnp.maximum(h0, 0.0).astype(cd)
    h1 = jnp.dot(h0, w1_ref[...], preferred_element_type=jnp.float32) + b1_ref[...]
    h1 = jnp.maximum(h1, 0.0).astype(cd)
    h2 = jnp.dot(h1, w2_ref[...], preferred_element_type=jnp.float32) + b2_ref[...]
    o_ref[...] = jnp.maximum(h2, 0.0).astype(o_ref.dtype)


def text_decoder_forward(x, params, *, batch_tile=None, compute_dtype=jnp.bfloat16):
    """Pallas implementation of TextDecoder.forward.

    x: [B, D_in] float32
    params: tuple (w0, b0, w1, b1, w2, b2) with wi: [in, out] f32, bi: [1, out] f32
    """
    (w0, b0, w1, b1, w2, b2) = params
    B, d_in = x.shape
    h0_dim, h1_dim, d_out = w0.shape[1], w1.shape[1], w2.shape[1]

    # --- batch tiling: fill the MXU (M=256 on v6e/v7x); whole batch if small ---
    if batch_tile is None:
        batch_tile = min(B, 256)
    n_tiles = pl.cdiv(B, batch_tile)
    B_pad = n_tiles * batch_tile
    if B_pad != B:
        x = jnp.pad(x, ((0, B_pad - B), (0, 0)))
    grid = (n_tiles,)

    # --- bf16 MXU operands; biases stay f32 (added after f32 accumulation) ---
    xc = x.astype(compute_dtype)
    w0c, w1c, w2c = (w.astype(compute_dtype) for w in (w0, w1, w2))

    # Weights/biases are small enough to live fully in VMEM for every tile
    # (constant block index -> fetched once, never re-DMA'd).
    full = lambda shape: pl.BlockSpec(shape, lambda i: (0, 0))

    # --- cost estimate (helps XLA overlap this call with surrounding ops) ---
    flops = 2 * B_pad * (d_in * h0_dim + h0_dim * h1_dim + h1_dim * d_out)
    c_item = jnp.dtype(compute_dtype).itemsize
    w_bytes = sum(w.size * c_item for w in (w0c, w1c, w2c))
    b_bytes = sum(b.size * b.dtype.itemsize for b in (b0, b1, b2))
    bytes_accessed = xc.size * c_item + B_pad * d_out * 4 + w_bytes + b_bytes
    cost = pl.CostEstimate(flops=flops, transcendentals=0,
                           bytes_accessed=bytes_accessed)

    # --- VMEM budget: 2x (x tile + out tile + weights + biases) + intermediates,
    #     clamped to the v7x physical 64 MiB ceiling ---
    x_tile_bytes = batch_tile * d_in * c_item
    o_tile_bytes = batch_tile * d_out * 4
    h_bytes = batch_tile * (h0_dim + h1_dim) * 4
    needed = 2 * (x_tile_bytes + o_tile_bytes + w_bytes + b_bytes) + 4 * h_bytes
    vmem_limit = int(min(64 * 2**20, max(32 * 2**20, 2 * needed)))

    out = pl.pallas_call(
        mlp3_relu_kernel,
        out_shape=jax.ShapeDtypeStruct((B_pad, d_out), jnp.float32),
        grid_spec=pltpu.PrefetchScalarGridSpec(
            num_scalar_prefetch=0,
            grid=grid,
            in_specs=[
                pl.BlockSpec((batch_tile, d_in), lambda i: (i, 0)),
                full(w0c.shape), full(b0.shape),
                full(w1c.shape), full(b1.shape),
                full(w2c.shape), full(b2.shape),
            ],
            out_specs=pl.BlockSpec((batch_tile, d_out), lambda i: (i, 0)),
        ),
        compiler_params=pltpu.CompilerParams(
            dimension_semantics=("parallel",),
            vmem_limit_bytes=vmem_limit,
        ),
        cost_estimate=cost,
    )(xc, w0c, b0, w1c, b1, w2c, b2)

    if B_pad != B:
        out = out[:B]
    return out


def init_params(key, dim_list):
    """Deterministic init of the MLP parameters (PyTorch-Linear-like uniform)."""
    params = []
    for in_dim, out_dim in zip(dim_list[:-1], dim_list[1:]):
        key, kw, kb = jax.random.split(key, 3)
        bound = 1.0 / jnp.sqrt(in_dim)
        w = jax.random.uniform(kw, (in_dim, out_dim), jnp.float32, -bound, bound)
        b = jax.random.uniform(kb, (1, out_dim), jnp.float32, -bound, bound)
        params += [w, b]
    return tuple(params)


def reference_forward(x, params, compute_dtype=jnp.bfloat16):
    """Reference with the same numerics as the kernel: bf16 operands, f32 accum."""
    (w0, b0, w1, b1, w2, b2) = params
    cd = compute_dtype
    h = jnp.maximum(
        jnp.dot(x.astype(cd), w0.astype(cd), preferred_element_type=jnp.float32) + b0, 0.0)
    h = jnp.maximum(
        jnp.dot(h.astype(cd), w1.astype(cd), preferred_element_type=jnp.float32) + b1, 0.0)
    h = jnp.maximum(
        jnp.dot(h.astype(cd), w2.astype(cd), preferred_element_type=jnp.float32) + b2, 0.0)
    return h


if __name__ == "__main__":
    # Small shapes consistent with TextDecoder(input_dim, hidden_dim=[h0, h1], output_dim)
    input_dim, hidden_dim, output_dim = 128, [128, 256], 512
    batch = 16

    dim_list = [input_dim] + hidden_dim + [output_dim]

    key = jax.random.PRNGKey(0)
    key, kx = jax.random.split(key)
    x = jax.random.normal(kx, (batch, input_dim), jnp.float32)
    params = init_params(key, dim_list)

    out = text_decoder_forward(x, params)
    out = jax.block_until_ready(out)

    ref = reference_forward(x, params, compute_dtype=jnp.bfloat16)
    assert out.shape == (batch, output_dim)
    max_err = float(jnp.max(jnp.abs(out - ref)))
    assert jnp.allclose(out, ref, atol=1e-2, rtol=1e-2), f"mismatch vs reference (max err {max_err})"

    print("KERNEL_OK")
</pallas_src>

<mosaic_0001>
module attributes {stable_mosaic.version = 11 : i64} {
  func.func @mlp3_relu_kernel(%arg0: i32, %arg1: memref<16x128xbf16, #tpu.memory_space<vmem>>, %arg2: memref<128x128xbf16, #tpu.memory_space<vmem>>, %arg3: memref<1x128xf32, #tpu.memory_space<vmem>>, %arg4: memref<128x256xbf16, #tpu.memory_space<vmem>>, %arg5: memref<1x256xf32, #tpu.memory_space<vmem>>, %arg6: memref<256x512xbf16, #tpu.memory_space<vmem>>, %arg7: memref<1x512xf32, #tpu.memory_space<vmem>>, %arg8: memref<16x512xf32, #tpu.memory_space<vmem>>) attributes {dimension_semantics = [#tpu.dimension_semantics<parallel>], iteration_bounds = array<i64: 1>, scalar_prefetch = 0 : i64, scratch_operands = 0 : i64, tpu.core_type = #tpu.core_type<tc>, window_params = [{transform_indices = @transform_0, window_bounds = array<i64: 16, 128>}, {pipeline_mode = #tpu.pipeline_mode<synchronous>, transform_indices = @transform_1, window_bounds = array<i64: 128, 128>}, {pipeline_mode = #tpu.pipeline_mode<synchronous>, transform_indices = @transform_2, window_bounds = array<i64: 1, 128>}, {pipeline_mode = #tpu.pipeline_mode<synchronous>, transform_indices = @transform_3, window_bounds = array<i64: 128, 256>}, {pipeline_mode = #tpu.pipeline_mode<synchronous>, transform_indices = @transform_4, window_bounds = array<i64: 1, 256>}, {pipeline_mode = #tpu.pipeline_mode<synchronous>, transform_indices = @transform_5, window_bounds = array<i64: 256, 512>}, {pipeline_mode = #tpu.pipeline_mode<synchronous>, transform_indices = @transform_6, window_bounds = array<i64: 1, 512>}, {transform_indices = @transform_7, window_bounds = array<i64: 16, 512>}]} {
    %c0 = arith.constant 0 : index
    %c0_0 = arith.constant 0 : index
    %0 = vector.load %arg1[%c0, %c0_0] : memref<16x128xbf16, #tpu.memory_space<vmem>>, vector<16x128xbf16>
    %c0_1 = arith.constant 0 : index
    %c0_2 = arith.constant 0 : index
    %1 = vector.load %arg2[%c0_1, %c0_2] : memref<128x128xbf16, #tpu.memory_space<vmem>>, vector<128x128xbf16>
    %cst = arith.constant dense<0.000000e+00> : vector<16x128xf32>
    %2 = tpu.matmul %0, %1, %cst {dimension_numbers = #tpu.dot_dimension_numbers<[1], [0], [0], [1], [0, 0, 1, 1], [], []>} : vector<16x128xbf16>, vector<128x128xbf16>, vector<16x128xf32> -> vector<16x128xf32>
    %c0_3 = arith.constant 0 : index
    %c0_4 = arith.constant 0 : index
    %3 = vector.load %arg3[%c0_3, %c0_4] : memref<1x128xf32, #tpu.memory_space<vmem>>, vector<1x128xf32>
    %4 = vector.broadcast %3 : vector<1x128xf32> to vector<16x128xf32>
    %5 = arith.addf %2, %4 : vector<16x128xf32>
    %cst_5 = arith.constant 0.000000e+00 : f32
    %6 = vector.broadcast %cst_5 : f32 to vector<16x128xf32>
    %7 = arith.maximumf %5, %6 : vector<16x128xf32>
    %8 = arith.truncf %7 : vector<16x128xf32> to vector<16x128xbf16>
    %c0_6 = arith.constant 0 : index
    %c0_7 = arith.constant 0 : index
    %9 = vector.load %arg4[%c0_6, %c0_7] : memref<128x256xbf16, #tpu.memory_space<vmem>>, vector<128x256xbf16>
    %cst_8 = arith.constant dense<0.000000e+00> : vector<16x256xf32>
    %10 = tpu.matmul %8, %9, %cst_8 {dimension_numbers = #tpu.dot_dimension_numbers<[1], [0], [0], [1], [0, 0, 1, 1], [], []>} : vector<16x128xbf16>, vector<128x256xbf16>, vector<16x256xf32> -> vector<16x256xf32>
    %c0_9 = arith.constant 0 : index
    %c0_10 = arith.constant 0 : index
    %11 = vector.load %arg5[%c0_9, %c0_10] : memref<1x256xf32, #tpu.memory_space<vmem>>, vector<1x256xf32>
    %12 = vector.broadcast %11 : vector<1x256xf32> to vector<16x256xf32>
    %13 = arith.addf %10, %12 : vector<16x256xf32>
    %cst_11 = arith.constant 0.000000e+00 : f32
    %14 = vector.broadcast %cst_11 : f32 to vector<16x256xf32>
    %15 = arith.maximumf %13, %14 : vector<16x256xf32>
    %16 = arith.truncf %15 : vector<16x256xf32> to vector<16x256xbf16>
    %c0_12 = arith.constant 0 : index
    %c0_13 = arith.constant 0 : index
    %17 = vector.load %arg6[%c0_12, %c0_13] : memref<256x512xbf16, #tpu.memory_space<vmem>>, vector<256x512xbf16>
    %cst_14 = arith.constant dense<0.000000e+00> : vector<16x512xf32>
    %18 = tpu.matmul %16, %17, %cst_14 {dimension_numbers = #tpu.dot_dimension_numbers<[1], [0], [0], [1], [0, 0, 1, 1], [], []>} : vector<16x256xbf16>, vector<256x512xbf16>, vector<16x512xf32> -> vector<16x512xf32>
    %c0_15 = arith.constant 0 : index
    %c0_16 = arith.constant 0 : index
    %19 = vector.load %arg7[%c0_15, %c0_16] : memref<1x512xf32, #tpu.memory_space<vmem>>, vector<1x512xf32>
    %20 = vector.broadcast %19 : vector<1x512xf32> to vector<16x512xf32>
    %21 = arith.addf %18, %20 : vector<16x512xf32>
    %cst_17 = arith.constant 0.000000e+00 : f32
    %22 = vector.broadcast %cst_17 : f32 to vector<16x512xf32>
    %23 = arith.maximumf %21, %22 : vector<16x512xf32>
    %c0_18 = arith.constant 0 : index
    %c0_19 = arith.constant 0 : index
    %24 = vector.load %arg8[%c0_18, %c0_19] : memref<16x512xf32, #tpu.memory_space<vmem>>, vector<16x512xf32>
    tpu.vector_store %arg8[%c0_18, %c0_19], %23 {strides = array<i32>} : memref<16x512xf32, #tpu.memory_space<vmem>>, vector<16x512xf32>,
    return
  }
  func.func @transform_0(%arg0: i32) -> (i32, i32) {
    %c0_i32 = arith.constant 0 : i32
    %c0_i32_0 = arith.constant 0 : i32
    return %arg0, %c0_i32 : i32, i32
  }
  func.func @transform_1(%arg0: i32) -> (i32, i32) {
    %c0_i32 = arith.constant 0 : i32
    %c0_i32_0 = arith.constant 0 : i32
    %c0_i32_1 = arith.constant 0 : i32
    return %c0_i32, %c0_i32_0 : i32, i32
  }
  func.func @transform_2(%arg0: i32) -> (i32, i32) {
    %c0_i32 = arith.constant 0 : i32
    %c0_i32_0 = arith.constant 0 : i32
    %c0_i32_1 = arith.constant 0 : i32
    return %c0_i32, %c0_i32_0 : i32, i32
  }
  func.func @transform_3(%arg0: i32) -> (i32, i32) {
    %c0_i32 = arith.constant 0 : i32
    %c0_i32_0 = arith.constant 0 : i32
    %c0_i32_1 = arith.constant 0 : i32
    return %c0_i32, %c0_i32_0 : i32, i32
  }
  func.func @transform_4(%arg0: i32) -> (i32, i32) {
    %c0_i32 = arith.constant 0 : i32
    %c0_i32_0 = arith.constant 0 : i32
    %c0_i32_1 = arith.constant 0 : i32
    return %c0_i32, %c0_i32_0 : i32, i32
  }
  func.func @transform_5(%arg0: i32) -> (i32, i32) {
    %c0_i32 = arith.constant 0 : i32
    %c0_i32_0 = arith.constant 0 : i32
    %c0_i32_1 = arith.constant 0 : i32
    return %c0_i32, %c0_i32_0 : i32, i32
  }
  func.func @transform_6(%arg0: i32) -> (i32, i32) {
    %c0_i32 = arith.constant 0 : i32
    %c0_i32_0 = arith.constant 0 : i32
    %c0_i32_1 = arith.constant 0 : i32
    return %c0_i32, %c0_i32_0 : i32, i32
  }
  func.func @transform_7(%arg0: i32) -> (i32, i32) {
    %c0_i32 = arith.constant 0 : i32
    %c0_i32_0 = arith.constant 0 : i32
    return %arg0, %c0_i32 : i32, i32
  }
}

</mosaic_0001>

<bundles_post_ra>
// kernel: tpu_custom_call.1
= control target key start
LH: loop header
LB: loop body
LE: loop exit
PB: predicated region body
PF: predicated region fallthrough
CT: control target
= control target key end

     0   :  { %12 = vsyncpa [#allocation3], 0  ;;  %s1342_s0 = inlined_call_operand.hbm [shape: bf16[16,128], index: 0, kind: input, shape index: {}]   ;;  %s1343_s1 = inlined_call_operand.hbm [shape: bf16[128,128], index: 1, kind: input, shape index: {}]   ;;  %s1344_s2 = inlined_call_operand.vmem [shape: f32[1,128], index: 2, kind: input, shape index: {}]   ;;  %s1345_s3 = inlined_call_operand.hbm [shape: bf16[128,256], index: 3, kind: input, shape index: {}]   ;;  %s1346_s4 = inlined_call_operand.vmem [shape: f32[1,256], index: 4, kind: input, shape index: {}]   ;;  %s1347_s5 = inlined_call_operand.hbm [shape: bf16[256,512], index: 5, kind: input, shape index: {}]   ;;  %s1348_s6 = inlined_call_operand.vmem [shape: f32[1,512], index: 6, kind: input, shape index: {}]   ;;  %s1349_s7 = inlined_call_operand.hbm [shape: f32[16,512], index: 7, kind: output, shape index: {}]  }
   0x1   :  { %13 = vsyncpa [#allocation6], 0 }
   0x2   :  { %14 = vsyncpa [#allocation9], 0 }
   0x3   :  { %15 = vsyncpa [#allocation4], 0  ;;  %s1262_s24 = smov [#allocation5]   ;;  %s1263_s26 = smov [#allocation2]  }
   0x4   :  { %s33_s25 = sshll.u32 %s1262_s24, 4  ;;  %s21_s27 = sshll.u32 %s1263_s26, 4  ;;  %s34_s25 = int_to_ptr.vmem [resolvable:$true] %s33_s25  ;;  %s22_s27 = int_to_ptr.vmem [resolvable:$true] %s21_s27 }
   0x5   :  { %s1162_s28 = scalar_lea.vmem %s34_s25, 1024  ;;  %p1167_p1 = scmp.lt.s32.totalorder %s34_s25, %s34_s25 }
   0x6   :  { %p1163_p0 = scmp.ne.s32.totalorder %s34_s25, %s1162_s28  ;;  %p1168_p2 = scmp.lt.s32.totalorder %s1162_s28, %s1162_s28 }
   0x8   :  { %p1169_p3 = por %p1168_p2, %p1167_p1 }
   0xa   :  { %p1170_p4 = pnand %p1169_p3, %p1163_p0 }
   0xc   :  { %1173 = shalt.err (!%p1170_p4)
}
   0xd   :  { %s1264_s29 = smov 64   ;;  %s1265_s30 = smov 4  }
   0xe   :  { %39 = dma.hbm_to_vmem [thread:$0]  %s1343_s1, 1024, %s34_s25, [#allocation6], %s1264_s29, %s1264_s29, %s1265_s30  }
   0xf   :  { %s1182_s10 = scalar_lea.vmem %s22_s27, 128  ;;  %p1187_p6 = scmp.lt.s32.totalorder %s22_s27, %s22_s27 }
  0x10   :  { %p1183_p5 = scmp.ne.s32.totalorder %s22_s27, %s1182_s10  ;;  %p1188_p7 = scmp.lt.s32.totalorder %s1182_s10, %s1182_s10 }
  0x12   :  { %p1189_p8 = por %p1188_p7, %p1187_p6 }
  0x14   :  { %p1190_p9 = pnand %p1189_p8, %p1183_p5 }
  0x16   :  { %1193 = shalt.err (!%p1190_p9)
}
  0x17   :  { %27 = dma.hbm_to_vmem [thread:$0]  %s1342_s0, 128, %s22_s27, [#allocation3], %s1264_s29, %s1264_s29, %s1265_s30  }
  0x18   :  { %s1266_s13 = smov [#allocation7]  }
  0x19   :  { %s47_s14 = sshll.u32 %s1266_s13, 4  ;;  %s48_s14 = int_to_ptr.vmem [resolvable:$true] %s47_s14 }
  0x1a   :  { %s1202_s15 = scalar_lea.vmem %s48_s14, 2048  ;;  %p1207_p11 = scmp.lt.s32.totalorder %s48_s14, %s48_s14 }
  0x1b   :  { %p1203_p10 = scmp.ne.s32.totalorder %s48_s14, %s1202_s15  ;;  %p1208_p12 = scmp.lt.s32.totalorder %s1202_s15, %s1202_s15 }
  0x1d   :  { %p1209_p13 = por %p1208_p12, %p1207_p11 }
  0x1f   :  { %p1210_p0 = pnand %p1209_p13, %p1203_p10 }
  0x21   :  { %1213 = shalt.err (!%p1210_p0)
}
  0x22   :  { %s1267_s1 = smov 128   ;;  %s1268_s16 = smov 8  }
  0x23   :  { %53 = dma.hbm_to_vmem [thread:$0]  %s1345_s3, 2048, %s48_s14, [#allocation6], %s1267_s1, %s1267_s1, %s1268_s16  }
  0x24   :  { %s1269_s19 = smov [#allocation8]  }
  0x25   :  { %s61_s20 = sshll.u32 %s1269_s19, 4  ;;  %s62_s20 = int_to_ptr.vmem [resolvable:$true] %s61_s20 }
  0x26   :  { %s1222_s0 = scalar_lea.vmem %s62_s20, 8192  ;;  %p1227_p2 = scmp.lt.s32.totalorder %s62_s20, %s62_s20 }
  0x27   :  { %p1223_p1 = scmp.ne.s32.totalorder %s62_s20, %s1222_s0  ;;  %p1228_p3 = scmp.lt.s32.totalorder %s1222_s0, %s1222_s0 }
  0x29   :  { %p1229_p4 = por %p1228_p3, %p1227_p2 }
  0x2b   :  { %p1230_p5 = pnand %p1229_p4, %p1223_p1 }
  0x2d   :  { %1233 = shalt.err (!%p1230_p5)
}
  0x2e   :  { %s1270_s21 = smov 256   ;;  %s1271_s22 = smov 16  }
  0x2f   :  { %67 = dma.hbm_to_vmem [thread:$0]  %s1347_s5, 8192, %s62_s20, [#allocation9], %s1270_s21, %s1270_s21, %s1271_s22  }
  0x30   :  { %1254 = dma.done.wait [#allocation3], 128  }
  0x31   :  { %1255 = vsyncadd [#allocation3], 4294967168 }
  0x32   :  { %1256 = dma.done.wait [#allocation6], 3072  }
  0x33   :  { %1257 = vsyncadd [#allocation6], 4294964224 }
  0x34   :  { %1258 = dma.done.wait [#allocation9], 8192  }
  0x35   :  { %1259 = vsyncadd [#allocation9], 4294959104  ;;  %v1272_v0 = vmov 0.0   ;;  %vm1273_vm0 = vmmov 0   ;;  %v1025_v1 = vld [vmem:[#allocation5 + $0x38] sm:$0xff]   ;;  %v1026_v2 = vld [vmem:[#allocation5 + $0x30] sm:$0xff]  }
  0x36   :  { %989 = vmatprep.subr.bf16.mxu0 %v1272_v0  ;;  %1005 = vmatprep.mubr.msk.bf16.mxu0 %vm1273_vm0, %v1272_v0  ;;  %v1027_v3 = vld [vmem:[#allocation5 + $0x28] sm:$0xff]   ;;  %v1028_v4 = vld [vmem:[#allocation5 + $0x20] sm:$0xff]   ;;  %v1034_v5 = vld [vmem:[#allocation7 + $0x74] ss:$8 sps:$4 sm:$0xff]   ;;  %v1274_v26 = vmov 0  }
  0x37   :  { %990 = vmatpush3.bf16.msra.mxu0 %v1025_v1  ;;  %v1036_v6 = vld [vmem:[#allocation7 + $0x70] ss:$8 sps:$4 sm:$0xff]   ;;  %314 = vmatprep.subr.bf16.mxu1 %v1034_v5  ;;  %v1037_v7 = vld [vmem:[#allocation7 + $0x64] ss:$8 sps:$4 sm:$0xff]   ;;  %v1039_v8 = vld [vmem:[#allocation7 + $0x60] ss:$8 sps:$4 sm:$0xff]  }
  0x38   :  { %991 = vmatprep.subr.bf16.mxu0 %v1272_v0  ;;  %315 = vmatpush1.bf16.msra.mxu1 %v1036_v6  ;;  %v1040_v9 = vld [vmem:[#allocation7 + $0x54] ss:$8 sps:$4 sm:$0xff]   ;;  %v1042_v12 = vld [vmem:[#allocation7 + $0x50] ss:$8 sps:$4 sm:$0xff]   ;;  %v1043_v13 = vld [vmem:[#allocation7 + $0x44] ss:$8 sps:$4 sm:$0xff]  }
  0x39   :  { %316 = vmatprep.subr.bf16.mxu1 %v1037_v7  ;;  %v1029_v10 = vld [vmem:[#allocation5 + $0x18] sm:$0xff]   ;;  %v1030_v11 = vld [vmem:[#allocation5 + $0x10] sm:$0xff]   ;;  %v1045_v14 = vld [vmem:[#allocation7 + $0x40] ss:$8 sps:$4 sm:$0xff]   ;;  %346 = vmatprep.mubr.bf16.mxu1 %v1274_v26 }
  0x3a   :  { %v1046_v15 = vld [vmem:[#allocation7 + $0x34] ss:$8 sps:$4 sm:$0xff]   ;;  %v1031_v16 = vld [vmem:[#allocation5 + $0x8] sm:$0xff]   ;;  %v1048_v17 = vld [vmem:[#allocation7 + $0x30] ss:$8 sps:$4 sm:$0xff]  }
  0x3b   :  { %992 = vmatpush3.bf16.msra.mxu0 %v1026_v2  ;;  %v1049_v18 = vld [vmem:[#allocation7 + $0x24] ss:$8 sps:$4 sm:$0xff]   ;;  %v1033_v20 = vld [vmem:[#allocation2] sm:$0xff]   ;;  %v1051_v21 = vld [vmem:[#allocation7 + $0x20] ss:$8 sps:$4 sm:$0xff]  }
  0x3c   :  { %993 = vmatprep.subr.bf16.mxu0 %v1272_v0  ;;  %317 = vmatpush1.bf16.msra.mxu1 %v1039_v8  ;;  %v1032_v19 = vld [vmem:[#allocation5] sm:$0xff]   ;;  %v1052_v22 = vld [vmem:[#allocation7 + $0x14] ss:$8 sps:$4 sm:$0xff]   ;;  %v1054_v23 = vld [vmem:[#allocation7 + $0x10] ss:$8 sps:$4 sm:$0xff]  }
  0x3d   :  { %318 = vmatprep.subr.bf16.mxu1 %v1040_v9  ;;  %v1055_v24 = vld [vmem:[#allocation7 + $0x4] ss:$8 sps:$4 sm:$0xff]   ;;  %v1057_v25 = vld [vmem:[#allocation7] ss:$8 sps:$4 sm:$0xff]   ;;  %v890_v54 = vld [vmem:[%s1344_s2] ss:$0 sm:$0xff] }
  0x3e   :  { %v1058_v27 = vld [vmem:[#allocation8 + $0xe0] ss:$16 sps:$4 sm:$0xff]   ;;  %v1060_v28 = vld [vmem:[#allocation8 + $0xe4] ss:$16 sps:$4 sm:$0xff]   ;;  %v1063_v29 = vld [vmem:[#allocation8 + $0xec] ss:$16 sps:$4 sm:$0xff]  }
  0x3f   :  { %994 = vmatpush3.bf16.msra.mxu0 %v1027_v3  ;;  %v1066_v30 = vld [vmem:[#allocation8 + $0xc4] ss:$16 sps:$4 sm:$0xff]   ;;  %v1064_v31 = vld [vmem:[#allocation8 + $0xc0] ss:$16 sps:$4 sm:$0xff]   ;;  %v1061_v63 = vld [vmem:[#allocation8 + $0xe8] ss:$16 sps:$4 sm:$0xff]  }
  0x40   :  { %995 = vmatprep.subr.bf16.mxu0 %v1272_v0  ;;  %319 = vmatpush1.bf16.msra.mxu1 %v1042_v12  ;;  %v1072_v32 = vld [vmem:[#allocation8 + $0xa4] ss:$16 sps:$4 sm:$0xff]   ;;  %v1070_v33 = vld [vmem:[#allocation8 + $0xa0] ss:$16 sps:$4 sm:$0xff]   ;;  %v1069_v1 = vld [vmem:[#allocation8 + $0xcc] ss:$16 sps:$4 sm:$0xff]  }
  0x41   :  { %320 = vmatprep.subr.bf16.mxu1 %v1043_v13  ;;  %v1078_v34 = vld [vmem:[#allocation8 + $0x84] ss:$16 sps:$4 sm:$0xff]   ;;  %v1076_v35 = vld [vmem:[#allocation8 + $0x80] ss:$16 sps:$4 sm:$0xff]   ;;  %v1067_v2 = vld [vmem:[#allocation8 + $0xc8] ss:$16 sps:$4 sm:$0xff]  }
  0x42   :  { %v1084_v36 = vld [vmem:[#allocation8 + $0x64] ss:$16 sps:$4 sm:$0xff]   ;;  %v1082_v37 = vld [vmem:[#allocation8 + $0x60] ss:$16 sps:$4 sm:$0xff]   ;;  %v1075_v3 = vld [vmem:[#allocation8 + $0xac] ss:$16 sps:$4 sm:$0xff]  }
  0x43   :  { %996 = vmatpush3.bf16.msra.mxu0 %v1028_v4  ;;  %v1090_v38 = vld [vmem:[#allocation8 + $0x44] ss:$16 sps:$4 sm:$0xff]   ;;  %v1088_v39 = vld [vmem:[#allocation8 + $0x40] ss:$16 sps:$4 sm:$0xff]   ;;  %v1073_v4 = vld [vmem:[#allocation8 + $0xa8] ss:$16 sps:$4 sm:$0xff]  }
  0x44   :  { %997 = vmatprep.subr.bf16.mxu0 %v1272_v0  ;;  %321 = vmatpush1.bf16.msra.mxu1 %v1045_v14  ;;  %v1096_v40 = vld [vmem:[#allocation8 + $0x24] ss:$16 sps:$4 sm:$0xff]   ;;  %v1094_v41 = vld [vmem:[#allocation8 + $0x20] ss:$16 sps:$4 sm:$0xff]   ;;  %v1081_v5 = vld [vmem:[#allocation8 + $0x8c] ss:$16 sps:$4 sm:$0xff]  }
  0x45   :  { %322 = vmatprep.subr.bf16.mxu1 %v1046_v15  ;;  %v1102_v42 = vld [vmem:[#allocation8 + $0x4] ss:$16 sps:$4 sm:$0xff]   ;;  %v1100_v43 = vld [vmem:[#allocation8] ss:$16 sps:$4 sm:$0xff]   ;;  %v1079_v6 = vld [vmem:[#allocation8 + $0x88] ss:$16 sps:$4 sm:$0xff]  }
  0x46   :  { %v1108_v44 = vld [vmem:[#allocation8 + $0x1e4] ss:$16 sps:$4 sm:$0xff]   ;;  %v1106_v45 = vld [vmem:[#allocation8 + $0x1e0] ss:$16 sps:$4 sm:$0xff]   ;;  %v1087_v7 = vld [vmem:[#allocation8 + $0x6c] ss:$16 sps:$4 sm:$0xff]  }
  0x47   :  { %998 = vmatpush3.bf16.msra.mxu0 %v1029_v10  ;;  %v1114_v46 = vld [vmem:[#allocation8 + $0x1c4] ss:$16 sps:$4 sm:$0xff]   ;;  %v1112_v47 = vld [vmem:[#allocation8 + $0x1c0] ss:$16 sps:$4 sm:$0xff]   ;;  %v1085_v8 = vld [vmem:[#allocation8 + $0x68] ss:$16 sps:$4 sm:$0xff]  }
  0x48   :  { %999 = vmatprep.subr.bf16.mxu0 %v1272_v0  ;;  %323 = vmatpush1.bf16.msra.mxu1 %v1048_v17  ;;  %v1120_v48 = vld [vmem:[#allocation8 + $0x1a4] ss:$16 sps:$4 sm:$0xff]   ;;  %v1118_v49 = vld [vmem:[#allocation8 + $0x1a0] ss:$16 sps:$4 sm:$0xff]   ;;  %v1093_v9 = vld [vmem:[#allocation8 + $0x4c] ss:$16 sps:$4 sm:$0xff]  }
  0x49   :  { %324 = vmatprep.subr.bf16.mxu1 %v1049_v18  ;;  %v1126_v50 = vld [vmem:[#allocation8 + $0x184] ss:$16 sps:$4 sm:$0xff]   ;;  %v1124_v51 = vld [vmem:[#allocation8 + $0x180] ss:$16 sps:$4 sm:$0xff]   ;;  %v1091_v10 = vld [vmem:[#allocation8 + $0x48] ss:$16 sps:$4 sm:$0xff]  }
  0x4a   :  { %v1132_v52 = vld [vmem:[#allocation8 + $0x164] ss:$16 sps:$4 sm:$0xff]   ;;  %v1130_v53 = vld [vmem:[#allocation8 + $0x160] ss:$16 sps:$4 sm:$0xff]   ;;  %v1097_v12 = vld [vmem:[#allocation8 + $0x28] ss:$16 sps:$4 sm:$0xff]  }
  0x4b   :  { %1000 = vmatpush3.bf16.msra.mxu0 %v1030_v11  ;;  %v1099_v11 = vld [vmem:[#allocation8 + $0x2c] ss:$16 sps:$4 sm:$0xff]   ;;  %v1103_v14 = vld [vmem:[#allocation8 + $0x8] ss:$16 sps:$4 sm:$0xff]  }
  0x4c   :  { %1001 = vmatprep.subr.bf16.mxu0 %v1272_v0  ;;  %325 = vmatpush1.bf16.msra.mxu1 %v1051_v21  ;;  %v1105_v13 = vld [vmem:[#allocation8 + $0xc] ss:$16 sps:$4 sm:$0xff]   ;;  %v1115_v18 = vld [vmem:[#allocation8 + $0x1c8] ss:$16 sps:$4 sm:$0xff]  }
  0x4d   :  { %326 = vmatprep.subr.bf16.mxu1 %v1052_v22  ;;  %v1111_v15 = vld [vmem:[#allocation8 + $0x1ec] ss:$16 sps:$4 sm:$0xff]   ;;  %v1127_v22 = vld [vmem:[#allocation8 + $0x188] ss:$16 sps:$4 sm:$0xff]  }
  0x4e   :  { %v1117_v17 = vld [vmem:[#allocation8 + $0x1cc] ss:$16 sps:$4 sm:$0xff]  }
  0x4f   :  { %1002 = vmatpush3.bf16.msra.mxu0 %v1031_v16  ;;  %v1109_v16 = vld [vmem:[#allocation8 + $0x1e8] ss:$16 sps:$4 sm:$0xff]   ;;  %v1129_v21 = vld [vmem:[#allocation8 + $0x18c] ss:$16 sps:$4 sm:$0xff]  }
  0x50   :  { %1003 = vmatprep.subr.bf16.mxu0 %v1272_v0  ;;  %327 = vmatpush1.bf16.msra.mxu1 %v1054_v23  ;;  %v1135_v23 = vld [vmem:[#allocation8 + $0x16c] ss:$16 sps:$4 sm:$0xff]  }
  0x51   :  { %328 = vmatprep.subr.bf16.mxu1 %v1055_v24  ;;  %v1133_v24 = vld [vmem:[#allocation8 + $0x168] ss:$16 sps:$4 sm:$0xff]   ;;  %v1141_v26 = vld [vmem:[#allocation8 + $0x14c] ss:$16 sps:$4 sm:$0xff]  }
  0x53   :  { %1004 = vmatpush3.bf16.msra.mxu0 %v1032_v19  ;;  %v1123_v19 = vld [vmem:[#allocation8 + $0x1ac] ss:$16 sps:$4 sm:$0xff]  }
  0x54   :  { %329 = vmatpush1.bf16.msra.mxu1 %v1057_v25  ;;  %769 = vmatprep.subr.bf16.mxu0 %v1060_v28  ;;  %v1138_v25 = vld [vmem:[#allocation8 + $0x144] ss:$16 sps:$4 sm:$0xff]   ;;  %v1139_v28 = vld [vmem:[#allocation8 + $0x148] ss:$16 sps:$4 sm:$0xff]  }
  0x55   :  { %812 = vmatprep.subr.bf16.mxu1 %v1063_v29  ;;  %v1144_v29 = vld [vmem:[#allocation8 + $0x124] ss:$16 sps:$4 sm:$0xff]  }
  0x56   :  { %1006 = vmatmul.mubr.bf16.vlgmr.msra.gmra.mxu0 %v1033_v20  ;;  %v1121_v20 = vld [vmem:[#allocation8 + $0x1a8] ss:$16 sps:$4 sm:$0xff]  }
  0x57   :  { %770 = vmatpush1.bf16.msra.mxu0 %v1058_v27  ;;  %v1136_v27 = vld [vmem:[#allocation8 + $0x140] ss:$16 sps:$4 sm:$0xff]  }
  0x58   :  { %771 = vmatprep.subr.bf16.mxu0 %v1066_v30  ;;  %v1147_v30 = vld [vmem:[#allocation8 + $0x12c] ss:$16 sps:$4 sm:$0xff]  }
  0x5b   :  { %772 = vmatpush1.bf16.msra.mxu0 %v1064_v31  ;;  %v1142_v31 = vld [vmem:[#allocation8 + $0x120] ss:$16 sps:$4 sm:$0xff]  }
  0x5c   :  { %773 = vmatprep.subr.bf16.mxu0 %v1072_v32  ;;  %v1145_v32 = vld [vmem:[#allocation8 + $0x128] ss:$16 sps:$4 sm:$0xff]  }
  0x5f   :  { %774 = vmatpush1.bf16.msra.mxu0 %v1070_v33  ;;  %v1150_v33 = vld [vmem:[#allocation8 + $0x104] ss:$16 sps:$4 sm:$0xff]  }
  0x60   :  { %775 = vmatprep.subr.bf16.mxu0 %v1078_v34  ;;  %v1153_v34 = vld [vmem:[#allocation8 + $0x10c] ss:$16 sps:$4 sm:$0xff]  }
  0x63   :  { %776 = vmatpush1.bf16.msra.mxu0 %v1076_v35  ;;  %v1148_v35 = vld [vmem:[#allocation8 + $0x100] ss:$16 sps:$4 sm:$0xff]  }
  0x64   :  { %777 = vmatprep.subr.bf16.mxu0 %v1084_v36  ;;  %v1151_v36 = vld [vmem:[#allocation8 + $0x108] ss:$16 sps:$4 sm:$0xff]  }
  0x67   :  { %778 = vmatpush1.bf16.msra.mxu0 %v1082_v37  ;;  %v224_v37 = vlaneseq }
  0x68   :  { %779 = vmatprep.subr.bf16.mxu0 %v1090_v38 }
  0x69   :  { %v225_v38 = vshrl.u32 %v224_v37, 7 }
  0x6b   :  { %780 = vmatpush1.bf16.msra.mxu0 %v1088_v39  ;;  %v230_v39 = vsub.s32 1, %v225_v38 }
  0x6c   :  { %781 = vmatprep.subr.bf16.mxu0 %v1096_v40  ;;  %v226_v40 = vsub.s32 0, %v225_v38 }
  0x6f   :  { %782 = vmatpush1.bf16.msra.mxu0 %v1094_v41  ;;  %v222_v41 = vld [vmem:[%s1346_s4] sm:$0x3] }
  0x70   :  { %783 = vmatprep.subr.bf16.mxu0 %v1102_v42 }
  0x73   :  { %784 = vmatpush1.bf16.msra.mxu0 %v1100_v43  ;;  %v231_v43 = vrot.slane %v222_v41, %v230_v39 }
  0x74   :  { %785 = vmatprep.subr.bf16.mxu0 %v1108_v44  ;;  %v227_v44 = vrot.slane %v222_v41, %v226_v40 }
  0x77   :  { %786 = vmatpush2.bf16.msra.mxu0 %v1106_v45 }
  0x78   :  { %787 = vmatprep.subr.bf16.mxu0 %v1114_v46 }
  0x7b   :  { %788 = vmatpush2.bf16.msra.mxu0 %v1112_v47 }
  0x7c   :  { %789 = vmatprep.subr.bf16.mxu0 %v1120_v48 }
  0x7f   :  { %790 = vmatpush2.bf16.msra.mxu0 %v1118_v49 }
  0x80   :  { %791 = vmatprep.subr.bf16.mxu0 %v1126_v50 }
  0x83   :  { %792 = vmatpush2.bf16.msra.mxu0 %v1124_v51 }
  0x84   :  { %793 = vmatprep.subr.bf16.mxu0 %v1132_v52 }
  0x87   :  { %794 = vmatpush2.bf16.msra.mxu0 %v1130_v53 }
  0x88   :  { %795 = vmatprep.subr.bf16.mxu0 %v1138_v25 }
  0x8b   :  { %796 = vmatpush2.bf16.msra.mxu0 %v1136_v27 }
  0x8c   :  { %797 = vmatprep.subr.bf16.mxu0 %v1144_v29 }
  0x8f   :  { %798 = vmatpush2.bf16.msra.mxu0 %v1142_v31 }
  0x90   :  { %799 = vmatprep.subr.bf16.mxu0 %v1150_v33 }
  0x93   :  { %800 = vmatpush2.bf16.msra.mxu0 %v1148_v35 }
 0x116   :  { %v196_v55 = vpop.f32.mrf.mxu0 }
 0x117   :  { %v197_v57 = vadd.f32 %v890_v54, %v196_v55 }
 0x118   :  { %v1007_v56 = vpop.f32.mrf.mxu0 }
 0x119   :  { %v203_v61 = vmax.f32 %v197_v57, 0.0 }
 0x11a   :  { %v199_v58 = vpop.f32.mrf.mxu0 }
 0x11b   :  { %v200_v59 = vadd.f32 %v890_v54, %v199_v58  ;;  %v439_v58 = vsub.s32 2, %v225_v38 }
 0x11c   :  { %v1008_v60 = vpop.f32.mrf.mxu0 }
 0x11d   :  { %v204_v62 = vmax.f32 %v200_v59, 0.0  ;;  %v427_v59 = vld [vmem:[%s1348_s6] sm:$0xf]  ;;  %v443_v60 = vsub.s32 3, %v225_v38  ;;  %s1275_s6 = smov [#allocation10]  }
 0x11e   :  { %s876_s27 = sshll.u32 %s1275_s6, 4  ;;  %s877_s27 = int_to_ptr.vmem [resolvable:$true] %s876_s27 }
 0x11f   :  { %v205_v0 = vpack.c.bf16 %v204_v62, %v203_v61  ;;  %v432_v61 = vrot.slane %v427_v59, %v226_v40  ;;  %v440_v62 = vrot.slane %v427_v59, %v439_v58  ;;  %s1234_s28 = scalar_lea.vmem %s877_s27, 1024  ;;  %p1239_p7 = scmp.lt.s32.totalorder %s877_s27, %s877_s27 }
 0x120   :  { %p1235_p6 = scmp.ne.s32.totalorder %s877_s27, %s1234_s28  ;;  %p1240_p8 = scmp.lt.s32.totalorder %s1234_s28, %s1234_s28 }
 0x121   :  { %347 = vmatmul.mubr.bf16.vlgmr.msra.gmra.mxu1 %v205_v0  ;;  %v444_v0 = vrot.slane %v427_v59, %v443_v60 }
 0x122   :  { %813 = vmatpush1.bf16.msra.mxu1 %v1061_v63  ;;  %v436_v63 = vrot.slane %v427_v59, %v230_v39  ;;  %p1241_p9 = por %p1240_p8, %p1239_p7 }
 0x123   :  { %814 = vmatprep.subr.bf16.mxu1 %v1069_v1 }
 0x124   :  { %p1242_p10 = pnand %p1241_p9, %p1235_p6 }
 0x126   :  { %815 = vmatpush1.bf16.msra.mxu1 %v1067_v2 }
 0x127   :  { %816 = vmatprep.subr.bf16.mxu1 %v1075_v3 }
 0x12a   :  { %817 = vmatpush1.bf16.msra.mxu1 %v1073_v4 }
 0x12b   :  { %818 = vmatprep.subr.bf16.mxu1 %v1081_v5 }
 0x12e   :  { %819 = vmatpush1.bf16.msra.mxu1 %v1079_v6 }
 0x12f   :  { %820 = vmatprep.subr.bf16.mxu1 %v1087_v7 }
 0x132   :  { %821 = vmatpush1.bf16.msra.mxu1 %v1085_v8 }
 0x133   :  { %822 = vmatprep.subr.bf16.mxu1 %v1093_v9 }
 0x136   :  { %823 = vmatpush1.bf16.msra.mxu1 %v1091_v10 }
 0x137   :  { %824 = vmatprep.subr.bf16.mxu1 %v1099_v11 }
 0x13a   :  { %825 = vmatpush1.bf16.msra.mxu1 %v1097_v12 }
 0x13b   :  { %826 = vmatprep.subr.bf16.mxu1 %v1105_v13 }
 0x13e   :  { %827 = vmatpush1.bf16.msra.mxu1 %v1103_v14 }
 0x13f   :  { %828 = vmatprep.subr.bf16.mxu1 %v1111_v15 }
 0x142   :  { %829 = vmatpush2.bf16.msra.mxu1 %v1109_v16 }
 0x143   :  { %830 = vmatprep.subr.bf16.mxu1 %v1117_v17 }
 0x146   :  { %831 = vmatpush2.bf16.msra.mxu1 %v1115_v18 }
 0x147   :  { %832 = vmatprep.subr.bf16.mxu1 %v1123_v19 }
 0x14a   :  { %833 = vmatpush2.bf16.msra.mxu1 %v1121_v20 }
 0x14b   :  { %834 = vmatprep.subr.bf16.mxu1 %v1129_v21 }
 0x14e   :  { %835 = vmatpush2.bf16.msra.mxu1 %v1127_v22 }
 0x14f   :  { %836 = vmatprep.subr.bf16.mxu1 %v1135_v23 }
 0x152   :  { %837 = vmatpush2.bf16.msra.mxu1 %v1133_v24 }
 0x153   :  { %838 = vmatprep.subr.bf16.mxu1 %v1141_v26 }
 0x156   :  { %839 = vmatpush2.bf16.msra.mxu1 %v1139_v28 }
 0x157   :  { %840 = vmatprep.subr.bf16.mxu1 %v1147_v30 }
 0x15a   :  { %841 = vmatpush2.bf16.msra.mxu1 %v1145_v32 }
 0x15b   :  { %842 = vmatprep.subr.bf16.mxu1 %v1153_v34 }
 0x15e   :  { %843 = vmatpush2.bf16.msra.mxu1 %v1151_v36 }
 0x1e1   :  { %v348_v42 = vpop.f32.mrf.mxu1 }
 0x1e2   :  { %v349_v49 = vadd.f32 %v348_v42, %v227_v44 }
 0x1e3   :  { %v350_v45 = vpop.f32.mrf.mxu1 }
 0x1e4   :  { %v351_v47 = vadd.f32 %v350_v45, %v231_v43  ;;  %v357_v55 = vmax.f32 %v349_v49, 0.0 }
 0x1e5   :  { %v352_v46 = vpop.f32.mrf.mxu1 }
 0x1e6   :  { %v353_v48 = vadd.f32 %v352_v46, %v227_v44  ;;  %v358_v53 = vmax.f32 %v351_v47, 0.0 }
 0x1e7   :  { %v354_v50 = vpop.f32.mrf.mxu1 }
 0x1e8   :  { %v355_v51 = vadd.f32 %v354_v50, %v231_v43  ;;  %v359_v52 = vmax.f32 %v353_v48, 0.0 }
 0x1ea   :  { %v360_v54 = vmax.f32 %v355_v51, 0.0  ;;  %v361_v57 = vpack.c.bf16 %v359_v52, %v357_v55 }
 0x1ec   :  { %v362_v56 = vpack.c.bf16 %v360_v54, %v358_v53 }
 0x1ee   :  { %801 = vmatprep.mubr.bf16.mxu0 %v362_v56  ;;  %844 = vmatprep.mubr.bf16.mxu1 %v362_v56 }
 0x1ef   :  { %802 = vmatmul.mubr.bf16.vlgmr.msra.gmra.mxu0 %v361_v57  ;;  %845 = vmatmul.mubr.bf16.vlgmr.msra.gmra.mxu1 %v361_v57 }
 0x2af   :  { %v803_v1 = vpop.f32.mrf.mxu0  ;;  %v846_v2 = vpop.f32.mrf.mxu1 }
 0x2b0   :  { %v804_v3 = vadd.f32 %v803_v1, %v432_v61  ;;  %v847_v4 = vadd.f32 %v846_v2, %v440_v62 }
 0x2b1   :  { %v805_v5 = vpop.f32.mrf.mxu0  ;;  %v848_v6 = vpop.f32.mrf.mxu1 }
 0x2b2   :  { %v855_v7 = vmax.f32 %v804_v3, 0.0  ;;  %v857_v8 = vmax.f32 %v847_v4, 0.0  ;;  %v806_v9 = vadd.f32 %v805_v5, %v436_v63  ;;  %v849_v10 = vadd.f32 %v848_v6, %v444_v0 }
 0x2b3   :  { %v807_v11 = vpop.f32.mrf.mxu0  ;;  %v850_v12 = vpop.f32.mrf.mxu1 }
 0x2b4   :  { %863 = vst [vmem:[#allocation10] sm:$0xff] %v855_v7  ;;  %865 = vst [vmem:[#allocation10 + $0x10] sm:$0xff] %v857_v8  ;;  %v856_v13 = vmax.f32 %v806_v9, 0.0  ;;  %v858_v14 = vmax.f32 %v849_v10, 0.0  ;;  %v808_v15 = vadd.f32 %v807_v11, %v432_v61  ;;  %v851_v16 = vadd.f32 %v850_v12, %v440_v62 }
 0x2b5   :  { %v809_v17 = vpop.f32.mrf.mxu0  ;;  %v852_v18 = vpop.f32.mrf.mxu1 }
 0x2b6   :  { %864 = vst [vmem:[#allocation10 + $0x8] sm:$0xff] %v856_v13  ;;  %866 = vst [vmem:[#allocation10 + $0x18] sm:$0xff] %v858_v14  ;;  %v859_v19 = vmax.f32 %v808_v15, 0.0  ;;  %v861_v20 = vmax.f32 %v851_v16, 0.0  ;;  %v810_v21 = vadd.f32 %v809_v17, %v436_v63  ;;  %v853_v22 = vadd.f32 %v852_v18, %v444_v0 }
 0x2b8   :  { %867 = vst [vmem:[#allocation10 + $0x20] sm:$0xff] %v859_v19  ;;  %869 = vst [vmem:[#allocation10 + $0x30] sm:$0xff] %v861_v20  ;;  %v860_v23 = vmax.f32 %v810_v21, 0.0  ;;  %v862_v24 = vmax.f32 %v853_v22, 0.0 }
 0x2ba   :  { %868 = vst [vmem:[#allocation10 + $0x28] sm:$0xff] %v860_v23  ;;  %870 = vst [vmem:[#allocation10 + $0x38] sm:$0xff] %v862_v24 }
 0x2bb   :  { %1245 = shalt.err (!%p1242_p10)
}
 0x2bc   :  { %s1276_s29 = smov 512   ;;  %s1277_s30 = smov 32  }
 0x2bd   :  { %882 = dma.vmem_to_hbm [thread:$0]  %s877_s27, 1024, %s1349_s7, [#allocation4], %s1276_s29, %s1276_s29, %s1277_s30  }
 0x2be   :  { %1260 = dma.done.wait [#allocation4], 1024  }
 0x2bf   :  { %1261 = vsyncadd [#allocation4], 4294966272 }
 0x2c0   :  { %886 = vsyncpa [#allocation3], 1 }
 0x2c1   :  { %887 = vsyncpa [#allocation6], 1 }
 0x2c2   :  { %888 = vsyncpa [#allocation9], 1 }
 0x2c3   :  { %889 = vsyncpa [#allocation4], 1 }

</bundles_post_ra>
